<compile_context>
chip_gen: v6e
topology: v6e:2x2x1
jax: 0.10.0
libtpu: 0.0.40
codegen_flags: <defaults>
</compile_context>

<pallas_src>
import functools

import jax
import jax.numpy as jnp
from jax.experimental import pallas as pl
from jax.experimental.pallas import tpu as pltpu

LANE = 128       # vreg lane width; feature/node dims are padded to this
BF16_PACK = 16   # bf16 packs 16 sublanes per vreg (128 is a multiple -> no relayout)


# --------------------------------------------------------------- utilities ---
def _round_up(v, m):
    return ((v + m - 1) // m) * m


def _pad2(a, rows, cols):
    return jnp.pad(a, ((0, rows - a.shape[0]), (0, cols - a.shape[1])))


def _pick_tile(dim, pref):
    """Largest multiple of LANE <= pref that divides dim (dim is a LANE multiple)."""
    t = min(pref, dim)
    while dim % t:
        t -= LANE
    return t


def _vmem_limit_bytes():
    """Budget ~half of physical VMEM per generation (64 MiB on v5e/v6e's 128 MiB
    parts, 32 MiB on v7x's 64 MiB) so tile choices never force spills on the
    smaller chip."""
    try:
        cap = pltpu.get_tpu_info().vmem_capacity_bytes
    except Exception:
        cap = 64 * 1024 * 1024
    return max(32 * 1024 * 1024, min(cap // 2, 64 * 1024 * 1024))


# ----------------------------------------------------------- graph / params ---
def build_scaled_laplacian(edge_index, edge_weight, num_nodes):
    """Dense Lhat = -D^-1/2 A D^-1/2 (sym norm, lambda_max=2, no self loops).
    NOTE: matches PyG ChebConv.__norm__ for symmetric (undirected) edge lists."""
    src, dst = edge_index[0], edge_index[1]
    a = jnp.zeros((num_nodes, num_nodes), jnp.float32).at[dst, src].add(edge_weight)
    deg = jnp.zeros((num_nodes,), jnp.float32).at[src].add(edge_weight)
    dinv = jnp.where(deg > 0, jax.lax.rsqrt(deg), 0.0)
    return -(dinv[:, None] * a * dinv[None, :])


def prepare_graph(lhat, pad_multiple):
    """One-time (hoisted): lane-dense pad + bf16 cast of the dense Lhat."""
    np_ = _round_up(lhat.shape[0], pad_multiple)
    return _pad2(lhat, np_, np_).astype(jnp.bfloat16)


def prepare_features(x, np_):
    """One-time (hoisted): pad node features to (Np, Fp) and cast bf16."""
    fp = _round_up(x.shape[1], LANE)
    return _pad2(x, np_, fp).astype(jnp.bfloat16)


def prepare_params(params):
    """One-time (hoisted): pad to lane multiples, column-stack [W0 | W1], cast bf16."""
    fin, hidden = params["w0_1"].shape
    classes = params["w0_2"].shape[1]
    fp, hp, cp = (_round_up(d, LANE) for d in (fin, hidden, classes))
    w1c = jnp.concatenate(
        [_pad2(params["w0_1"], fp, hp), _pad2(params["w1_1"], fp, hp)], axis=1
    ).astype(jnp.bfloat16)                                   # (Fp, 2*Hp)
    w2c = jnp.concatenate(
        [_pad2(params["w0_2"], hp, cp), _pad2(params["w1_2"], hp, cp)], axis=1
    ).astype(jnp.bfloat16)                                   # (Hp, 2*Cp)
    b1 = _pad2(params["b_1"], 1, hp)                         # f32 epilogue
    b2 = _pad2(params["b_2"], 1, cp)
    return {"w1c": w1c, "b1": b1, "w2c": w2c, "b2": b2}


def glorot(key, fan_in, fan_out):
    lim = jnp.sqrt(6.0 / (fan_in + fan_out))
    return jax.random.uniform(key, (fan_in, fan_out), jnp.float32, -lim, lim)


def init_params(key, num_features, hidden, num_classes):
    k = jax.random.split(key, 4)
    return {
        "w0_1": glorot(k[0], num_features, hidden),
        "w1_1": glorot(k[1], num_features, hidden),
        "b_1": jnp.zeros((1, hidden), jnp.float32),
        "w0_2": glorot(k[2], hidden, num_classes),
        "w1_2": glorot(k[3], hidden, num_classes),
        "b_2": jnp.zeros((1, num_classes), jnp.float32),
    }


# --------------------------------------------------- fused kernel (tiny N) ---
def _fused_kernel(lhat_ref, x_ref, w1_ref, b1_ref, w2_ref, b2_ref, o_ref, *, hp, cp):
    """relu(cheb1(x)) -> cheb2, with the dense Lhat resident in VMEM.

    Each ChebConv uses the associativity form x@W0 + Lhat@(x@W1) + b, with a
    single column-stacked weight dot x @ [W0|W1] feeding both terms. bf16 MXU
    operands, f32 accumulation and f32 epilogue."""
    lhat = lhat_ref[...]                                                # (Np,Np) bf16
    x = x_ref[...]                                                      # (Np,Fp) bf16

    # layer 1: ChebConv(Fin, hidden) + ReLU
    xw = jnp.dot(x, w1_ref[...], preferred_element_type=jnp.float32)    # (Np,2Hp) f32
    tx = jnp.dot(lhat, xw[:, hp:].astype(jnp.bfloat16),
                 preferred_element_type=jnp.float32)                    # (Np,Hp) f32
    h = jnp.maximum(xw[:, :hp] + tx + b1_ref[...], 0.0)

    # TODO(synk): F.dropout(training=self.training) is identity in eval mode;
    # training-mode RNG masking is not implemented.

    # layer 2: ChebConv(hidden, classes)
    hb = h.astype(jnp.bfloat16)
    hw = jnp.dot(hb, w2_ref[...], preferred_element_type=jnp.float32)   # (Np,2Cp) f32
    tx2 = jnp.dot(lhat, hw[:, cp:].astype(jnp.bfloat16),
                  preferred_element_type=jnp.float32)
    o_ref[...] = (hw[:, :cp] + tx2 + b2_ref[...]).astype(o_ref.dtype)   # lane-dense store


def chebnet_fused(lhat_p, x_p, w1c, b1, w2c, b2):
    np_, fp = x_p.shape
    h2, c2 = w1c.shape[1], w2c.shape[1]
    hp, cp = h2 // 2, c2 // 2
    return pl.pallas_call(
        functools.partial(_fused_kernel, hp=hp, cp=cp),
        out_shape=jax.ShapeDtypeStruct((np_, cp), jnp.float32),
        grid_spec=pl.GridSpec(
            grid=(1,),
            in_specs=[
                pl.BlockSpec((np_, np_), lambda i: (0, 0)),   # Lhat (resident once)
                pl.BlockSpec((np_, fp), lambda i: (0, 0)),    # x
                pl.BlockSpec((fp, h2), lambda i: (0, 0)),     # [W0_1 | W1_1]
                pl.BlockSpec((1, hp), lambda i: (0, 0)),      # b1
                pl.BlockSpec((hp, c2), lambda i: (0, 0)),     # [W0_2 | W1_2]
                pl.BlockSpec((1, cp), lambda i: (0, 0)),      # b2
            ],
            out_specs=pl.BlockSpec((np_, cp), lambda i: (0, 0)),
        ),
        compiler_params=pltpu.CompilerParams(
            dimension_semantics=("arbitrary",),
            vmem_limit_bytes=_vmem_limit_bytes(),
        ),
    )(lhat_p, x_p, w1c, b1, w2c, b2)


# ---------------------------------------------- tiled kernels (realistic N) ---
def _matmul_kernel(x_ref, w_ref, o_ref, acc_ref):
    """o = x @ w, row-tiled over grid axis 0 with a K-reduction over axis 1."""
    @pl.when(pl.program_id(1) == 0)
    def _():
        acc_ref[...] = jnp.zeros_like(acc_ref)

    acc_ref[...] += jnp.dot(x_ref[...].astype(jnp.bfloat16), w_ref[...],
                            preferred_element_type=jnp.float32)

    @pl.when(pl.program_id(1) == pl.num_programs(1) - 1)
    def _():
        o_ref[...] = acc_ref[...].astype(o_ref.dtype)


def _propagate_kernel(lhat_ref, xw1_ref, xw0_ref, b_ref, o_ref, acc_ref, *, relu):
    """o[i] = xw0[i] + sum_k Lhat[i,k] @ xw1[k] + b   (+ optional ReLU)."""
    k = pl.program_id(1)

    @pl.when(k == 0)
    def _():
        acc_ref[...] = xw0_ref[...] + b_ref[...]

    acc_ref[...] += jnp.dot(lhat_ref[...], xw1_ref[...].astype(jnp.bfloat16),
                            preferred_element_type=jnp.float32)

    @pl.when(k == pl.num_programs(1) - 1)
    def _():
        out = acc_ref[...]
        if relu:
            out = jnp.maximum(out, 0.0)
        o_ref[...] = out.astype(o_ref.dtype)


def _cheb_layer_tiled(lhat_p, x_p, wcat, b, *, relu, tm, tk, vmem_limit):
    """One ChebConv layer, row/K tiled. Row axis is "parallel" (v7x megacore),
    the reduction axis is "arbitrary" and last."""
    np_ = lhat_p.shape[0]
    kf = x_p.shape[1]
    h2 = wcat.shape[1]
    hp = h2 // 2
    tm_ = _pick_tile(np_, tm)
    tkf = _pick_tile(kf, tk)
    tkn = _pick_tile(np_, tk)
    cparams = pltpu.CompilerParams(
        dimension_semantics=("parallel", "arbitrary"),
        vmem_limit_bytes=vmem_limit,
    )

    # xw = x @ [W0 | W1]   (tall-skinny matmul; f32 output, xw1 re-cast below)
    xw = pl.pallas_call(
        _matmul_kernel,
        out_shape=jax.ShapeDtypeStruct((np_, h2), jnp.float32),
        grid_spec=pltpu.PrefetchScalarGridSpec(
            num_scalar_prefetch=0,
            grid=(np_ // tm_, kf // tkf),
            in_specs=[pl.BlockSpec((tm_, tkf), lambda i, k: (i, k)),
                      pl.BlockSpec((tkf, h2), lambda i, k: (k, 0))],
            out_specs=pl.BlockSpec((tm_, h2), lambda i, k: (i, 0)),
            scratch_shapes=[pltpu.VMEM((tm_, h2), jnp.float32)],
        ),
        compiler_params=cparams,
    )(x_p, wcat)

    # out = xw0 + Lhat @ xw1 + b   (dominant O(N^2 * H) matmul, row/K tiled)
    return pl.pallas_call(
        functools.partial(_propagate_kernel, relu=relu),
        out_shape=jax.ShapeDtypeStruct((np_, hp), jnp.float32),
        grid_spec=pltpu.PrefetchScalarGridSpec(
            num_scalar_prefetch=0,
            grid=(np_ // tm_, np_ // tkn),
            in_specs=[pl.BlockSpec((tm_, tkn), lambda i, k: (i, k)),   # Lhat tile
                      pl.BlockSpec((tkn, hp), lambda i, k: (k, 1)),    # xw1 K-panel
                      pl.BlockSpec((tm_, hp), lambda i, k: (i, 0)),    # xw0 row-panel
                      pl.BlockSpec((1, hp), lambda i, k: (0, 0))],     # bias
            out_specs=pl.BlockSpec((tm_, hp), lambda i, k: (i, 0)),
            scratch_shapes=[pltpu.VMEM((tm_, hp), jnp.float32)],
        ),
        compiler_params=cparams,
    )(lhat_p, xw, xw, b)


# ------------------------------------------------------------------ forward ---
@functools.partial(jax.jit,
                   static_argnames=("num_nodes", "num_classes", "tiled", "tm", "tk"))
def chebnet_forward(x_p, lhat_p, prepped, *, num_nodes, num_classes,
                    tiled=False, tm=256, tk=256):
    """Forward only — all padding / casting / weight stacking has been pre-done."""
    if tiled:
        vmem = _vmem_limit_bytes()
        h = _cheb_layer_tiled(lhat_p, x_p, prepped["w1c"], prepped["b1"],
                              relu=True, tm=tm, tk=tk, vmem_limit=vmem)
        # TODO(synk): dropout is identity in eval mode (no RNG masking).
        out_p = _cheb_layer_tiled(lhat_p, h, prepped["w2c"], prepped["b2"],
                                  relu=False, tm=tm, tk=tk, vmem_limit=vmem)
    else:
        out_p = chebnet_fused(lhat_p, x_p, prepped["w1c"], prepped["b1"],
                              prepped["w2c"], prepped["b2"])
    return out_p[:num_nodes, :num_classes]


def chebnet_reference(x, lhat, params):
    """Pure-JAX f32 reference (mirrors the PyG eval-mode forward)."""
    def cheb(v, w0, w1, b):
        return v @ w0 + (lhat @ v) @ w1 + b
    h = jax.nn.relu(cheb(x, params["w0_1"], params["w1_1"], params["b_1"]))
    return cheb(h, params["w0_2"], params["w1_2"], params["b_2"])


# --------------------------------------------------------------------- main ---
if __name__ == "__main__":
    NUM_NODES = 16
    NUM_FEATURES = 8
    HIDDEN = 32
    NUM_CLASSES = 4

    key = jax.random.PRNGKey(0)
    k_x, k_p = jax.random.split(key)

    x = jax.random.normal(k_x, (NUM_NODES, NUM_FEATURES), jnp.float32)

    # Symmetric ring graph with extra chords (deterministic), unit edge weights.
    srcs, dsts = [], []
    for i in range(NUM_NODES):
        for j in (i + 1, i + 3):
            a, b = i, j % NUM_NODES
            srcs += [a, b]
            dsts += [b, a]
    edge_index = jnp.array([srcs, dsts], dtype=jnp.int32)          # (2, 64)
    edge_weight = jnp.ones((edge_index.shape[1],), jnp.float32)

    lhat = build_scaled_laplacian(edge_index, edge_weight, NUM_NODES)
    params = init_params(k_p, NUM_FEATURES, HIDDEN, NUM_CLASSES)

    # One-time layout prep (hoisted out of the per-call forward).
    prepped = prepare_params(params)

    # --- tiny-N fused path: lane-dense N padded to 128, single pallas_call ---
    lhat_f = prepare_graph(lhat, pad_multiple=LANE)
    x_f = prepare_features(x, lhat_f.shape[0])
    out = chebnet_forward(x_f, lhat_f, prepped,
                          num_nodes=NUM_NODES, num_classes=NUM_CLASSES, tiled=False)
    jax.block_until_ready(out)

    # --- tiled path (realistic-N formulation), forced multi-tile here --------
    TM = TK = 128
    lhat_t = prepare_graph(lhat, pad_multiple=2 * TM)   # pad N to 256 -> 2x2 grid
    x_t = prepare_features(x, lhat_t.shape[0])
    out_tiled = chebnet_forward(x_t, lhat_t, prepped,
                                num_nodes=NUM_NODES, num_classes=NUM_CLASSES,
                                tiled=True, tm=TM, tk=TK)
    jax.block_until_ready(out_tiled)

    ref = chebnet_reference(x, lhat, params)

    assert out.shape == (NUM_NODES, NUM_CLASSES), out.shape
    assert out.dtype == jnp.float32, out.dtype
    assert jnp.allclose(out, out_tiled, atol=2e-2, rtol=2e-2), \
        float(jnp.abs(out - out_tiled).max())
    assert jnp.allclose(out, ref, atol=1e-1, rtol=1e-1), \
        float(jnp.abs(out - ref).max())
    print("KERNEL_OK")
</pallas_src>

<mosaic_0001>
module attributes {stable_mosaic.version = 11 : i64} {
  func.func @_fused_kernel(%arg0: i32, %arg1: memref<128x128xbf16, #tpu.memory_space<vmem>>, %arg2: memref<128x128xbf16, #tpu.memory_space<vmem>>, %arg3: memref<128x256xbf16, #tpu.memory_space<vmem>>, %arg4: memref<1x128xf32, #tpu.memory_space<vmem>>, %arg5: memref<128x256xbf16, #tpu.memory_space<vmem>>, %arg6: memref<1x128xf32, #tpu.memory_space<vmem>>, %arg7: memref<128x128xf32, #tpu.memory_space<vmem>>) attributes {dimension_semantics = [#tpu.dimension_semantics<arbitrary>], iteration_bounds = array<i64: 1>, scalar_prefetch = 0 : i64, scratch_operands = 0 : i64, tpu.core_type = #tpu.core_type<tc>, window_params = [{pipeline_mode = #tpu.pipeline_mode<synchronous>, transform_indices = @transform_0, window_bounds = array<i64: 128, 128>}, {pipeline_mode = #tpu.pipeline_mode<synchronous>, transform_indices = @transform_1, window_bounds = array<i64: 128, 128>}, {pipeline_mode = #tpu.pipeline_mode<synchronous>, transform_indices = @transform_2, window_bounds = array<i64: 128, 256>}, {pipeline_mode = #tpu.pipeline_mode<synchronous>, transform_indices = @transform_3, window_bounds = array<i64: 1, 128>}, {pipeline_mode = #tpu.pipeline_mode<synchronous>, transform_indices = @transform_4, window_bounds = array<i64: 128, 256>}, {pipeline_mode = #tpu.pipeline_mode<synchronous>, transform_indices = @transform_5, window_bounds = array<i64: 1, 128>}, {pipeline_mode = #tpu.pipeline_mode<synchronous>, transform_indices = @transform_6, window_bounds = array<i64: 128, 128>}]} {
    %c0 = arith.constant 0 : index
    %c0_0 = arith.constant 0 : index
    %0 = vector.load %arg1[%c0, %c0_0] : memref<128x128xbf16, #tpu.memory_space<vmem>>, vector<128x128xbf16>
    %c0_1 = arith.constant 0 : index
    %c0_2 = arith.constant 0 : index
    %1 = vector.load %arg2[%c0_1, %c0_2] : memref<128x128xbf16, #tpu.memory_space<vmem>>, vector<128x128xbf16>
    %c0_3 = arith.constant 0 : index
    %c0_4 = arith.constant 0 : index
    %2 = vector.load %arg3[%c0_3, %c0_4] : memref<128x256xbf16, #tpu.memory_space<vmem>>, vector<128x256xbf16>
    %cst = arith.constant dense<0.000000e+00> : vector<128x256xf32>
    %3 = tpu.matmul %1, %2, %cst {dimension_numbers = #tpu.dot_dimension_numbers<[1], [0], [0], [1], [0, 0, 1, 1], [], []>} : vector<128x128xbf16>, vector<128x256xbf16>, vector<128x256xf32> -> vector<128x256xf32>
    %4 = vector.extract_strided_slice %3 {offsets = [0, 128], sizes = [128, 128], strides = [1, 1]} : vector<128x256xf32> to vector<128x128xf32>
    %5 = arith.truncf %4 : vector<128x128xf32> to vector<128x128xbf16>
    %cst_5 = arith.constant dense<0.000000e+00> : vector<128x128xf32>
    %6 = tpu.matmul %0, %5, %cst_5 {dimension_numbers = #tpu.dot_dimension_numbers<[1], [0], [0], [1], [0, 0, 1, 1], [], []>} : vector<128x128xbf16>, vector<128x128xbf16>, vector<128x128xf32> -> vector<128x128xf32>
    %7 = vector.extract_strided_slice %3 {offsets = [0, 0], sizes = [128, 128], strides = [1, 1]} : vector<128x256xf32> to vector<128x128xf32>
    %8 = arith.addf %7, %6 : vector<128x128xf32>
    %c0_6 = arith.constant 0 : index
    %c0_7 = arith.constant 0 : index
    %9 = vector.load %arg4[%c0_6, %c0_7] : memref<1x128xf32, #tpu.memory_space<vmem>>, vector<1x128xf32>
    %10 = vector.broadcast %9 : vector<1x128xf32> to vector<128x128xf32>
    %11 = arith.addf %8, %10 : vector<128x128xf32>
    %cst_8 = arith.constant 0.000000e+00 : f32
    %12 = vector.broadcast %cst_8 : f32 to vector<128x128xf32>
    %13 = arith.maximumf %11, %12 : vector<128x128xf32>
    %14 = arith.truncf %13 : vector<128x128xf32> to vector<128x128xbf16>
    %c0_9 = arith.constant 0 : index
    %c0_10 = arith.constant 0 : index
    %15 = vector.load %arg5[%c0_9, %c0_10] : memref<128x256xbf16, #tpu.memory_space<vmem>>, vector<128x256xbf16>
    %cst_11 = arith.constant dense<0.000000e+00> : vector<128x256xf32>
    %16 = tpu.matmul %14, %15, %cst_11 {dimension_numbers = #tpu.dot_dimension_numbers<[1], [0], [0], [1], [0, 0, 1, 1], [], []>} : vector<128x128xbf16>, vector<128x256xbf16>, vector<128x256xf32> -> vector<128x256xf32>
    %17 = vector.extract_strided_slice %16 {offsets = [0, 128], sizes = [128, 128], strides = [1, 1]} : vector<128x256xf32> to vector<128x128xf32>
    %18 = arith.truncf %17 : vector<128x128xf32> to vector<128x128xbf16>
    %cst_12 = arith.constant dense<0.000000e+00> : vector<128x128xf32>
    %19 = tpu.matmul %0, %18, %cst_12 {dimension_numbers = #tpu.dot_dimension_numbers<[1], [0], [0], [1], [0, 0, 1, 1], [], []>} : vector<128x128xbf16>, vector<128x128xbf16>, vector<128x128xf32> -> vector<128x128xf32>
    %20 = vector.extract_strided_slice %16 {offsets = [0, 0], sizes = [128, 128], strides = [1, 1]} : vector<128x256xf32> to vector<128x128xf32>
    %21 = arith.addf %20, %19 : vector<128x128xf32>
    %c0_13 = arith.constant 0 : index
    %c0_14 = arith.constant 0 : index
    %22 = vector.load %arg6[%c0_13, %c0_14] : memref<1x128xf32, #tpu.memory_space<vmem>>, vector<1x128xf32>
    %23 = vector.broadcast %22 : vector<1x128xf32> to vector<128x128xf32>
    %24 = arith.addf %21, %23 : vector<128x128xf32>
    %c0_15 = arith.constant 0 : index
    %c0_16 = arith.constant 0 : index
    %25 = vector.load %arg7[%c0_15, %c0_16] : memref<128x128xf32, #tpu.memory_space<vmem>>, vector<128x128xf32>
    tpu.vector_store %arg7[%c0_15, %c0_16], %24 {strides = array<i32>} : memref<128x128xf32, #tpu.memory_space<vmem>>, vector<128x128xf32>,
    return
  }
  func.func @transform_0(%arg0: i32) -> (i32, i32) {
    %c0_i32 = arith.constant 0 : i32
    %c0_i32_0 = arith.constant 0 : i32
    %c0_i32_1 = arith.constant 0 : i32
    return %c0_i32, %c0_i32_0 : i32, i32
  }
  func.func @transform_1(%arg0: i32) -> (i32, i32) {
    %c0_i32 = arith.constant 0 : i32
    %c0_i32_0 = arith.constant 0 : i32
    %c0_i32_1 = arith.constant 0 : i32
    return %c0_i32, %c0_i32_0 : i32, i32
  }
  func.func @transform_2(%arg0: i32) -> (i32, i32) {
    %c0_i32 = arith.constant 0 : i32
    %c0_i32_0 = arith.constant 0 : i32
    %c0_i32_1 = arith.constant 0 : i32
    return %c0_i32, %c0_i32_0 : i32, i32
  }
  func.func @transform_3(%arg0: i32) -> (i32, i32) {
    %c0_i32 = arith.constant 0 : i32
    %c0_i32_0 = arith.constant 0 : i32
    %c0_i32_1 = arith.constant 0 : i32
    return %c0_i32, %c0_i32_0 : i32, i32
  }
  func.func @transform_4(%arg0: i32) -> (i32, i32) {
    %c0_i32 = arith.constant 0 : i32
    %c0_i32_0 = arith.constant 0 : i32
    %c0_i32_1 = arith.constant 0 : i32
    return %c0_i32, %c0_i32_0 : i32, i32
  }
  func.func @transform_5(%arg0: i32) -> (i32, i32) {
    %c0_i32 = arith.constant 0 : i32
    %c0_i32_0 = arith.constant 0 : i32
    %c0_i32_1 = arith.constant 0 : i32
    return %c0_i32, %c0_i32_0 : i32, i32
  }
  func.func @transform_6(%arg0: i32) -> (i32, i32) {
    %c0_i32 = arith.constant 0 : i32
    %c0_i32_0 = arith.constant 0 : i32
    %c0_i32_1 = arith.constant 0 : i32
    return %c0_i32, %c0_i32_0 : i32, i32
  }
}

</mosaic_0001>

<bundles_post_ra>
// kernel: chebnet_forward.1
= control target key start
LH: loop header
LB: loop body
LE: loop exit
PB: predicated region body
PF: predicated region fallthrough
CT: control target
= control target key end

     0   :  { %11 = vsyncpa [#allocation3], 0  ;;  %s1530_s0 = inlined_call_operand.hbm [shape: bf16[128,128], index: 0, kind: input, shape index: {}]   ;;  %s1531_s1 = inlined_call_operand.hbm [shape: bf16[128,128], index: 1, kind: input, shape index: {}]   ;;  %s1532_s2 = inlined_call_operand.hbm [shape: bf16[128,256], index: 2, kind: input, shape index: {}]   ;;  %s1533_s3 = inlined_call_operand.vmem [shape: f32[1,128], index: 3, kind: input, shape index: {}]   ;;  %s1534_s4 = inlined_call_operand.hbm [shape: bf16[128,256], index: 4, kind: input, shape index: {}]   ;;  %s1535_s5 = inlined_call_operand.vmem [shape: f32[1,128], index: 5, kind: input, shape index: {}]   ;;  %s1536_s6 = inlined_call_operand.vmem [shape: f32[128,128], index: 6, kind: output, shape index: {}]  }
   0x1   :  { %12 = vsyncpa [#allocation5], 0 }
   0x2   :  { %13 = vsyncpa [#allocation8], 0  ;;  %s1265_s21 = smov [#allocation4]   ;;  %s1266_s23 = smov [#allocation2]  }
   0x3   :  { %s31_s22 = sshll.u32 %s1265_s21, 4  ;;  %s19_s24 = sshll.u32 %s1266_s23, 4  ;;  %s32_s22 = int_to_ptr.vmem [resolvable:$true] %s31_s22  ;;  %s20_s24 = int_to_ptr.vmem [resolvable:$true] %s19_s24 }
   0x4   :  { %s1187_s25 = scalar_lea.vmem %s32_s22, 1024  ;;  %p1192_p1 = scmp.lt.s32.totalorder %s32_s22, %s32_s22 }
   0x5   :  { %p1188_p0 = scmp.ne.s32.totalorder %s32_s22, %s1187_s25  ;;  %p1193_p2 = scmp.lt.s32.totalorder %s1187_s25, %s1187_s25 }
   0x7   :  { %p1194_p3 = por %p1193_p2, %p1192_p1 }
   0x9   :  { %p1195_p4 = pnand %p1194_p3, %p1188_p0 }
   0xb   :  { %1198 = shalt.err (!%p1195_p4)
}
   0xc   :  { %s1267_s26 = smov 64   ;;  %s1268_s27 = smov 4  }
   0xd   :  { %37 = dma.hbm_to_vmem [thread:$0]  %s1531_s1, 1024, %s32_s22, [#allocation5], %s1267_s26, %s1267_s26, %s1268_s27  }
   0xe   :  { %s1207_s30 = scalar_lea.vmem %s20_s24, 1024  ;;  %p1212_p6 = scmp.lt.s32.totalorder %s20_s24, %s20_s24 }
   0xf   :  { %p1208_p5 = scmp.ne.s32.totalorder %s20_s24, %s1207_s30  ;;  %p1213_p7 = scmp.lt.s32.totalorder %s1207_s30, %s1207_s30 }
  0x11   :  { %p1214_p8 = por %p1213_p7, %p1212_p6 }
  0x13   :  { %p1215_p9 = pnand %p1214_p8, %p1208_p5 }
  0x15   :  { %1218 = shalt.err (!%p1215_p9)
}
  0x16   :  { %25 = dma.hbm_to_vmem [thread:$0]  %s1530_s0, 1024, %s20_s24, [#allocation3], %s1267_s26, %s1267_s26, %s1268_s27  }
  0x17   :  { %s1269_s9 = smov [#allocation6]  }
  0x18   :  { %s43_s10 = sshll.u32 %s1269_s9, 4  ;;  %s44_s10 = int_to_ptr.vmem [resolvable:$true] %s43_s10 }
  0x19   :  { %s1227_s11 = scalar_lea.vmem %s44_s10, 2048  ;;  %p1232_p11 = scmp.lt.s32.totalorder %s44_s10, %s44_s10 }
  0x1a   :  { %p1228_p10 = scmp.ne.s32.totalorder %s44_s10, %s1227_s11  ;;  %p1233_p12 = scmp.lt.s32.totalorder %s1227_s11, %s1227_s11 }
  0x1c   :  { %p1234_p13 = por %p1233_p12, %p1232_p11 }
  0x1e   :  { %p1235_p0 = pnand %p1234_p13, %p1228_p10 }
  0x20   :  { %1238 = shalt.err (!%p1235_p0)
}
  0x21   :  { %s1270_s1 = smov 128   ;;  %s1271_s12 = smov 8  }
  0x22   :  { %49 = dma.hbm_to_vmem [thread:$0]  %s1532_s2, 2048, %s44_s10, [#allocation5], %s1270_s1, %s1270_s1, %s1271_s12  }
  0x23   :  { %s1272_s15 = smov [#allocation7]  }
  0x24   :  { %s57_s16 = sshll.u32 %s1272_s15, 4  ;;  %s58_s16 = int_to_ptr.vmem [resolvable:$true] %s57_s16 }
  0x25   :  { %s1247_s0 = scalar_lea.vmem %s58_s16, 2048  ;;  %p1252_p2 = scmp.lt.s32.totalorder %s58_s16, %s58_s16 }
  0x26   :  { %p1248_p1 = scmp.ne.s32.totalorder %s58_s16, %s1247_s0  ;;  %p1253_p3 = scmp.lt.s32.totalorder %s1247_s0, %s1247_s0 }
  0x28   :  { %p1254_p4 = por %p1253_p3, %p1252_p2 }
  0x2a   :  { %p1255_p5 = pnand %p1254_p4, %p1248_p1 }
  0x2c   :  { %1258 = shalt.err (!%p1255_p5)
}
  0x2d   :  { %63 = dma.hbm_to_vmem [thread:$0]  %s1534_s4, 2048, %s58_s16, [#allocation8], %s1270_s1, %s1270_s1, %s1271_s12  }
  0x2e   :  { %1259 = dma.done.wait [#allocation3], 1024  }
  0x2f   :  { %1260 = vsyncadd [#allocation3], 4294966272 }
  0x30   :  { %1261 = dma.done.wait [#allocation5], 3072  }
  0x31   :  { %1262 = vsyncadd [#allocation5], 4294964224 }
  0x32   :  { %1263 = dma.done.wait [#allocation8], 2048  }
  0x33   :  { %1264 = vsyncadd [#allocation8], 4294965248  ;;  %v1273_v0 = vmov 0   ;;  %v1115_v1 = vld [vmem:[#allocation6 + $0x74] ss:$8 sps:$4 sm:$0xff]   ;;  %v1139_v17 = vld [vmem:[#allocation4] sm:$0xff]  }
  0x34   :  { %287 = vmatprep.mubr.bf16.mxu0 %v1273_v0  ;;  %v1117_v2 = vld [vmem:[#allocation6 + $0x70] ss:$8 sps:$4 sm:$0xff]   ;;  %255 = vmatprep.subr.bf16.mxu0 %v1115_v1  ;;  %v1118_v3 = vld [vmem:[#allocation6 + $0x64] ss:$8 sps:$4 sm:$0xff]   ;;  %v1120_v4 = vld [vmem:[#allocation6 + $0x60] ss:$8 sps:$4 sm:$0xff]  }
  0x35   :  { %256 = vmatpush1.bf16.msra.mxu0 %v1117_v2  ;;  %v1121_v5 = vld [vmem:[#allocation6 + $0x54] ss:$8 sps:$4 sm:$0xff]   ;;  %v1123_v6 = vld [vmem:[#allocation6 + $0x50] ss:$8 sps:$4 sm:$0xff]   ;;  %v1124_v7 = vld [vmem:[#allocation6 + $0x44] ss:$8 sps:$4 sm:$0xff]  }
  0x36   :  { %257 = vmatprep.subr.bf16.mxu0 %v1118_v3  ;;  %v1126_v8 = vld [vmem:[#allocation6 + $0x40] ss:$8 sps:$4 sm:$0xff]   ;;  %v1127_v9 = vld [vmem:[#allocation6 + $0x34] ss:$8 sps:$4 sm:$0xff]   ;;  %v1129_v10 = vld [vmem:[#allocation6 + $0x30] ss:$8 sps:$4 sm:$0xff]  }
  0x37   :  { %v1130_v11 = vld [vmem:[#allocation6 + $0x24] ss:$8 sps:$4 sm:$0xff]   ;;  %v1132_v12 = vld [vmem:[#allocation6 + $0x20] ss:$8 sps:$4 sm:$0xff]   ;;  %v1133_v13 = vld [vmem:[#allocation6 + $0x14] ss:$8 sps:$4 sm:$0xff]  }
  0x38   :  { %v1135_v14 = vld [vmem:[#allocation6 + $0x10] ss:$8 sps:$4 sm:$0xff]   ;;  %v1136_v15 = vld [vmem:[#allocation6 + $0x4] ss:$8 sps:$4 sm:$0xff]   ;;  %v1138_v16 = vld [vmem:[#allocation6] ss:$8 sps:$4 sm:$0xff]  }
  0x39   :  { %258 = vmatpush1.bf16.msra.mxu0 %v1120_v4  ;;  %v1140_v18 = vld [vmem:[#allocation4 + $0x8] sm:$0xff]   ;;  %v1141_v19 = vld [vmem:[#allocation4 + $0x10] sm:$0xff]   ;;  %v1142_v20 = vld [vmem:[#allocation4 + $0x18] sm:$0xff]  }
  0x3a   :  { %259 = vmatprep.subr.bf16.mxu0 %v1121_v5  ;;  %v1143_v21 = vld [vmem:[#allocation4 + $0x20] sm:$0xff]   ;;  %v1144_v22 = vld [vmem:[#allocation4 + $0x28] sm:$0xff]   ;;  %v1145_v23 = vld [vmem:[#allocation4 + $0x30] sm:$0xff]  }
  0x3b   :  { %v1146_v24 = vld [vmem:[#allocation4 + $0x38] sm:$0xff]   ;;  %v1147_v25 = vld [vmem:[#allocation2] sm:$0xff]   ;;  %v1361_v4 = vld [vmem:[#allocation2 + $0x8] sm:$0xff]  }
  0x3c   :  { %1058 = vmatprep.mubr.bf16.mxu1 %v1147_v25  ;;  %v1157_v3 = vld [vmem:[#allocation7 + $0x74] ss:$8 sps:$4 sm:$0xff]  }
  0x3d   :  { %260 = vmatpush1.bf16.msra.mxu0 %v1123_v6  ;;  %v1363_v5 = vld [vmem:[#allocation2 + $0x10] sm:$0xff]  }
  0x3e   :  { %261 = vmatprep.subr.bf16.mxu0 %v1124_v7  ;;  %v1155_v6 = vld [vmem:[#allocation7 + $0x70] ss:$8 sps:$4 sm:$0xff]   ;;  %v1160_v7 = vld [vmem:[#allocation7 + $0x64] ss:$8 sps:$4 sm:$0xff]  }
  0x41   :  { %262 = vmatpush1.bf16.msra.mxu0 %v1126_v8  ;;  %v1158_v8 = vld [vmem:[#allocation7 + $0x60] ss:$8 sps:$4 sm:$0xff]  }
  0x42   :  { %263 = vmatprep.subr.bf16.mxu0 %v1127_v9  ;;  %v1163_v9 = vld [vmem:[#allocation7 + $0x54] ss:$8 sps:$4 sm:$0xff]  }
  0x45   :  { %264 = vmatpush1.bf16.msra.mxu0 %v1129_v10  ;;  %v1367_v10 = vld [vmem:[#allocation2 + $0x18] sm:$0xff]  }
  0x46   :  { %265 = vmatprep.subr.bf16.mxu0 %v1130_v11  ;;  %v1369_v11 = vld [vmem:[#allocation2 + $0x20] sm:$0xff]  }
  0x49   :  { %266 = vmatpush1.bf16.msra.mxu0 %v1132_v12  ;;  %v1161_v12 = vld [vmem:[#allocation7 + $0x50] ss:$8 sps:$4 sm:$0xff]  }
  0x4a   :  { %267 = vmatprep.subr.bf16.mxu0 %v1133_v13  ;;  %v1166_v13 = vld [vmem:[#allocation7 + $0x44] ss:$8 sps:$4 sm:$0xff]  }
  0x4d   :  { %268 = vmatpush1.bf16.msra.mxu0 %v1135_v14  ;;  %v1164_v14 = vld [vmem:[#allocation7 + $0x40] ss:$8 sps:$4 sm:$0xff]  }
  0x4e   :  { %269 = vmatprep.subr.bf16.mxu0 %v1136_v15  ;;  %v1169_v15 = vld [vmem:[#allocation7 + $0x34] ss:$8 sps:$4 sm:$0xff]  }
  0x51   :  { %270 = vmatpush1.bf16.msra.mxu0 %v1138_v16  ;;  %v1373_v16 = vld [vmem:[#allocation2 + $0x28] sm:$0xff]  }
  0x54   :  { %288 = vmatmul.mubr.bf16.vlgmr.msra.gmra.mxu0 %v1139_v17  ;;  %v1375_v17 = vld [vmem:[#allocation2 + $0x30] sm:$0xff]  }
  0x55   :  { %297 = vmatprep.mubr.bf16.mxu0 %v1273_v0 }
  0x5c   :  { %298 = vmatmul.mubr.bf16.gmra.mxu0 %v1140_v18  ;;  %v1167_v18 = vld [vmem:[#allocation7 + $0x30] ss:$8 sps:$4 sm:$0xff]  }
  0x5d   :  { %307 = vmatprep.mubr.bf16.mxu0 %v1273_v0 }
  0x64   :  { %308 = vmatmul.mubr.bf16.gmra.mxu0 %v1141_v19  ;;  %v1379_v19 = vld [vmem:[#allocation2 + $0x38] sm:$0xff]  }
  0x65   :  { %317 = vmatprep.mubr.bf16.mxu0 %v1273_v0 }
  0x6c   :  { %318 = vmatmul.mubr.bf16.gmra.mxu0 %v1142_v20  ;;  %v1172_v20 = vld [vmem:[#allocation7 + $0x24] ss:$8 sps:$4 sm:$0xff]  }
  0x6d   :  { %327 = vmatprep.mubr.bf16.mxu0 %v1273_v0 }
  0x74   :  { %328 = vmatmul.mubr.bf16.gmra.mxu0 %v1143_v21  ;;  %v1170_v21 = vld [vmem:[#allocation7 + $0x20] ss:$8 sps:$4 sm:$0xff]  }
  0x75   :  { %337 = vmatprep.mubr.bf16.mxu0 %v1273_v0 }
  0x7c   :  { %338 = vmatmul.mubr.bf16.gmra.mxu0 %v1144_v22  ;;  %v1175_v22 = vld [vmem:[#allocation7 + $0x14] ss:$8 sps:$4 sm:$0xff]  }
  0x7d   :  { %347 = vmatprep.mubr.bf16.mxu0 %v1273_v0 }
  0x84   :  { %348 = vmatmul.mubr.bf16.gmra.mxu0 %v1145_v23  ;;  %v1173_v23 = vld [vmem:[#allocation7 + $0x10] ss:$8 sps:$4 sm:$0xff]  }
  0x85   :  { %357 = vmatprep.mubr.bf16.mxu0 %v1273_v0 }
  0x8c   :  { %358 = vmatmul.mubr.bf16.gmra.mxu0 %v1146_v24  ;;  %v1178_v24 = vld [vmem:[#allocation7 + $0x4] ss:$8 sps:$4 sm:$0xff]  }
  0x8d   :  { %1090 = vmatprep.mubr.bf16.mxu0 %v1147_v25  ;;  %v1176_v25 = vld [vmem:[#allocation7] ss:$8 sps:$4 sm:$0xff]  }
 0x114   :  { %v1329_v26 = vpop.f32.mrf.mxu0 }
 0x116   :  { %v291_v27 = vpop.f32.mrf.mxu0 }
 0x118   :  { %v1331_v28 = vpop.f32.mrf.mxu0 }
 0x11a   :  { %v295_v29 = vpop.f32.mrf.mxu0 }
 0x11b   :  { %v368_v30 = vpack.c.bf16 %v295_v29, %v291_v27 }
 0x11c   :  { %v1333_v31 = vpop.f32.mrf.mxu0 }
 0x11e   :  { %v301_v32 = vpop.f32.mrf.mxu0 }
 0x120   :  { %v1335_v33 = vpop.f32.mrf.mxu0 }
 0x122   :  { %v305_v34 = vpop.f32.mrf.mxu0 }
 0x123   :  { %v369_v35 = vpack.c.bf16 %v305_v34, %v301_v32  ;;  %v1387_v34 = vld [vmem:[%s1533_s3] ss:$0 sm:$0xff] }
 0x124   :  { %v1337_v36 = vpop.f32.mrf.mxu0 }
 0x126   :  { %v311_v37 = vpop.f32.mrf.mxu0 }
 0x128   :  { %v1339_v38 = vpop.f32.mrf.mxu0 }
 0x12a   :  { %v315_v39 = vpop.f32.mrf.mxu0 }
 0x12b   :  { %v370_v2 = vpack.c.bf16 %v315_v39, %v311_v37 }
 0x12c   :  { %v1341_v40 = vpop.f32.mrf.mxu0 }
 0x12e   :  { %v321_v41 = vpop.f32.mrf.mxu0 }
 0x130   :  { %v1343_v42 = vpop.f32.mrf.mxu0 }
 0x132   :  { %v325_v43 = vpop.f32.mrf.mxu0 }
 0x133   :  { %v371_v1 = vpack.c.bf16 %v325_v43, %v321_v41 }
 0x134   :  { %v1345_v44 = vpop.f32.mrf.mxu0 }
 0x136   :  { %v331_v45 = vpop.f32.mrf.mxu0 }
 0x138   :  { %v1347_v46 = vpop.f32.mrf.mxu0 }
 0x13a   :  { %v335_v47 = vpop.f32.mrf.mxu0 }
 0x13b   :  { %v372_v63 = vpack.c.bf16 %v335_v47, %v331_v45 }
 0x13c   :  { %v1349_v48 = vpop.f32.mrf.mxu0 }
 0x13e   :  { %v341_v49 = vpop.f32.mrf.mxu0 }
 0x140   :  { %v1351_v50 = vpop.f32.mrf.mxu0 }
 0x142   :  { %v345_v51 = vpop.f32.mrf.mxu0 }
 0x143   :  { %v373_v62 = vpack.c.bf16 %v345_v51, %v341_v49 }
 0x144   :  { %v1353_v52 = vpop.f32.mrf.mxu0 }
 0x146   :  { %v351_v53 = vpop.f32.mrf.mxu0 }
 0x148   :  { %v1355_v54 = vpop.f32.mrf.mxu0 }
 0x14a   :  { %v355_v55 = vpop.f32.mrf.mxu0 }
 0x14b   :  { %v374_v61 = vpack.c.bf16 %v355_v55, %v351_v53 }
 0x14c   :  { %v1357_v56 = vpop.f32.mrf.mxu0 }
 0x14e   :  { %v361_v57 = vpop.f32.mrf.mxu0 }
 0x150   :  { %v1359_v58 = vpop.f32.mrf.mxu0 }
 0x152   :  { %v365_v59 = vpop.f32.mrf.mxu0 }
 0x153   :  { %v375_v60 = vpack.c.bf16 %v365_v59, %v361_v57 }
 0x155   :  { %1042 = vmatprep.subr.bf16.mxu1 %v375_v60 }
 0x156   :  { %1043 = vmatpush3.bf16.msra.mxu1 %v375_v60 }
 0x157   :  { %1044 = vmatprep.subr.bf16.mxu1 %v374_v61 }
 0x15a   :  { %1045 = vmatpush3.bf16.msra.mxu1 %v374_v61 }
 0x15b   :  { %1046 = vmatprep.subr.bf16.mxu1 %v373_v62 }
 0x15e   :  { %1047 = vmatpush3.bf16.msra.mxu1 %v373_v62 }
 0x15f   :  { %1048 = vmatprep.subr.bf16.mxu1 %v372_v63 }
 0x162   :  { %1049 = vmatpush3.bf16.msra.mxu1 %v372_v63 }
 0x163   :  { %1050 = vmatprep.subr.bf16.mxu1 %v371_v1 }
 0x166   :  { %1051 = vmatpush3.bf16.msra.mxu1 %v371_v1 }
 0x167   :  { %1052 = vmatprep.subr.bf16.mxu1 %v370_v2 }
 0x16a   :  { %1053 = vmatpush3.bf16.msra.mxu1 %v370_v2 }
 0x16b   :  { %1054 = vmatprep.subr.bf16.mxu1 %v369_v35 }
 0x16e   :  { %1055 = vmatpush3.bf16.msra.mxu1 %v369_v35 }
 0x16f   :  { %1056 = vmatprep.subr.bf16.mxu1 %v368_v30 }
 0x172   :  { %1057 = vmatpush3.bf16.msra.mxu1 %v368_v30 }
 0x173   :  { %680 = vmatprep.subr.bf16.mxu1 %v1157_v3 }
 0x175   :  { %1059 = vmatmul.mubr.bf16.vlgmr.msra.gmra.mxu1 %v1361_v4 }
 0x176   :  { %1062 = vmatprep.mubr.bf16.mxu1 %v1363_v5  ;;  %681 = vmatpush1.bf16.msra.mxu1 %v1155_v6 }
 0x177   :  { %682 = vmatprep.subr.bf16.mxu1 %v1160_v7 }
 0x17a   :  { %683 = vmatpush1.bf16.msra.mxu1 %v1158_v8 }
 0x17b   :  { %684 = vmatprep.subr.bf16.mxu1 %v1163_v9 }
 0x17d   :  { %1063 = vmatmul.mubr.bf16.gmra.mxu1 %v1367_v10 }
 0x17e   :  { %1066 = vmatprep.mubr.bf16.mxu1 %v1369_v11  ;;  %685 = vmatpush1.bf16.msra.mxu1 %v1161_v12 }
 0x17f   :  { %686 = vmatprep.subr.bf16.mxu1 %v1166_v13 }
 0x182   :  { %687 = vmatpush1.bf16.msra.mxu1 %v1164_v14 }
 0x183   :  { %688 = vmatprep.subr.bf16.mxu1 %v1169_v15 }
 0x185   :  { %1067 = vmatmul.mubr.bf16.gmra.mxu1 %v1373_v16 }
 0x186   :  { %1070 = vmatprep.mubr.bf16.mxu1 %v1375_v17  ;;  %689 = vmatpush1.bf16.msra.mxu1 %v1167_v18 }
 0x187   :  { %690 = vmatprep.subr.bf16.mxu1 %v1172_v20 }
 0x18a   :  { %691 = vmatpush1.bf16.msra.mxu1 %v1170_v21 }
 0x18b   :  { %692 = vmatprep.subr.bf16.mxu1 %v1175_v22 }
 0x18d   :  { %1071 = vmatmul.mubr.bf16.gmra.mxu1 %v1379_v19 }
 0x18e   :  { %712 = vmatprep.mubr.bf16.mxu1 %v1273_v0  ;;  %693 = vmatpush1.bf16.msra.mxu1 %v1173_v23 }
 0x18f   :  { %694 = vmatprep.subr.bf16.mxu1 %v1178_v24 }
 0x192   :  { %695 = vmatpush1.bf16.msra.mxu1 %v1176_v25 }
 0x235   :  { %v1060_v27 = vpop.f32.mrf.mxu1 }
 0x236   :  { %v523_v49 = vadd.f32 %v1060_v27, %v1333_v31 }
 0x237   :  { %v458_v29 = vpop.f32.mrf.mxu1 }
 0x238   :  { %v521_v30 = vadd.f32 %v458_v29, %v1329_v26  ;;  %v546_v60 = vadd.f32 %v1387_v34, %v523_v49 }
 0x239   :  { %v1061_v32 = vpop.f32.mrf.mxu1 }
 0x23a   :  { %v544_v37 = vadd.f32 %v1387_v34, %v521_v30  ;;  %v524_v43 = vadd.f32 %v1061_v32, %v1335_v33  ;;  %v562_v62 = vmax.f32 %v546_v60, 0.0 }
 0x23b   :  { %v461_v35 = vpop.f32.mrf.mxu1 }
 0x23c   :  { %v522_v39 = vadd.f32 %v461_v35, %v1331_v28  ;;  %v560_v26 = vmax.f32 %v544_v37, 0.0  ;;  %v547_v55 = vadd.f32 %v1387_v34, %v524_v43 }
 0x23d   :  { %v1064_v41 = vpop.f32.mrf.mxu1 }
 0x23e   :  { %v545_v45 = vadd.f32 %v1387_v34, %v522_v39  ;;  %v563_v28 = vmax.f32 %v547_v55, 0.0  ;;  %v527_v9 = vadd.f32 %v1064_v41, %v1341_v40 }
 0x23f   :  { %v474_v47 = vpop.f32.mrf.mxu1 }
 0x240   :  { %v561_v51 = vmax.f32 %v545_v45, 0.0  ;;  %v525_v63 = vadd.f32 %v474_v47, %v1337_v36  ;;  %v577_v1 = vpack.c.bf16 %v563_v28, %v562_v62  ;;  %v550_v14 = vadd.f32 %v1387_v34, %v527_v9 }
 0x241   :  { %v1065_v53 = vpop.f32.mrf.mxu1 }
 0x242   :  { %v576_v57 = vpack.c.bf16 %v561_v51, %v560_v26  ;;  %v548_v3 = vadd.f32 %v1387_v34, %v525_v63  ;;  %v528_v6 = vadd.f32 %v1065_v53, %v1343_v42  ;;  %v566_v21 = vmax.f32 %v550_v14, 0.0 }
 0x243   :  { %v477_v59 = vpop.f32.mrf.mxu1 }
 0x244   :  { %713 = vmatmul.mubr.bf16.vlgmr.msra.gmra.mxu1 %v576_v57  ;;  %v526_v33 = vadd.f32 %v477_v59, %v1339_v38  ;;  %v564_v38 = vmax.f32 %v548_v3, 0.0  ;;  %v551_v12 = vadd.f32 %v1387_v34, %v528_v6 }
 0x245   :  { %722 = vmatprep.mubr.bf16.mxu1 %v1273_v0  ;;  %v1068_v61 = vpop.f32.mrf.mxu1 }
 0x246   :  { %v549_v31 = vadd.f32 %v1387_v34, %v526_v33  ;;  %v567_v15 = vmax.f32 %v551_v12, 0.0  ;;  %v531_v30 = vadd.f32 %v1068_v61, %v1349_v48 }
 0x247   :  { %v490_v2 = vpop.f32.mrf.mxu1 }
 0x248   :  { %v565_v7 = vmax.f32 %v549_v31, 0.0  ;;  %v529_v42 = vadd.f32 %v490_v2, %v1345_v44  ;;  %v579_v40 = vpack.c.bf16 %v567_v15, %v566_v21  ;;  %v554_v37 = vadd.f32 %v1387_v34, %v531_v30 }
 0x249   :  { %v1069_v8 = vpop.f32.mrf.mxu1 }
 0x24a   :  { %v578_v13 = vpack.c.bf16 %v565_v7, %v564_v38  ;;  %v552_v24 = vadd.f32 %v1387_v34, %v529_v42  ;;  %v532_v25 = vadd.f32 %v1069_v8, %v1351_v50  ;;  %v570_v43 = vmax.f32 %v554_v37, 0.0 }
 0x24b   :  { %v493_v36 = vpop.f32.mrf.mxu1 }
 0x24c   :  { %723 = vmatmul.mubr.bf16.gmra.mxu1 %v577_v1  ;;  %v530_v18 = vadd.f32 %v493_v36, %v1347_v46  ;;  %v568_v46 = vmax.f32 %v552_v24, 0.0  ;;  %v555_v32 = vadd.f32 %v1387_v34, %v532_v25 }
 0x24d   :  { %732 = vmatprep.mubr.bf16.mxu1 %v1273_v0  ;;  %v1072_v20 = vpop.f32.mrf.mxu1 }
 0x24e   :  { %v553_v22 = vadd.f32 %v1387_v34, %v530_v18  ;;  %v571_v39 = vmax.f32 %v555_v32, 0.0  ;;  %v535_v51 = vadd.f32 %v1072_v20, %v1357_v56 }
 0x24f   :  { %v506_v23 = vpop.f32.mrf.mxu1 }
 0x250   :  { %v569_v27 = vmax.f32 %v553_v22, 0.0  ;;  %v533_v50 = vadd.f32 %v506_v23, %v1353_v52  ;;  %v581_v47 = vpack.c.bf16 %v571_v39, %v570_v43  ;;  %v558_v57 = vadd.f32 %v1387_v34, %v535_v51 }
 0x251   :  { %v1073_v29 = vpop.f32.mrf.mxu1 }
 0x252   :  { %v580_v35 = vpack.c.bf16 %v569_v27, %v568_v46  ;;  %v556_v48 = vadd.f32 %v1387_v34, %v533_v50  ;;  %v536_v49 = vadd.f32 %v1073_v29, %v1359_v58  ;;  %v574_v59 = vmax.f32 %v558_v57, 0.0 }
 0x253   :  { %v509_v44 = vpop.f32.mrf.mxu1 }
 0x254   :  { %733 = vmatmul.mubr.bf16.gmra.mxu1 %v578_v13  ;;  %v534_v41 = vadd.f32 %v509_v44, %v1355_v54  ;;  %v572_v53 = vmax.f32 %v556_v48, 0.0  ;;  %v559_v55 = vadd.f32 %v1387_v34, %v536_v49 }
 0x255   :  { %742 = vmatprep.mubr.bf16.mxu1 %v1273_v0 }
 0x256   :  { %v557_v45 = vadd.f32 %v1387_v34, %v534_v41  ;;  %v575_v52 = vmax.f32 %v559_v55, 0.0  ;;  %v1009_v41 = vld [vmem:[%s1535_s5] ss:$0 sm:$0xff] }
 0x258   :  { %v573_v26 = vmax.f32 %v557_v45, 0.0  ;;  %v583_v60 = vpack.c.bf16 %v575_v52, %v574_v59 }
 0x25a   :  { %v582_v54 = vpack.c.bf16 %v573_v26, %v572_v53 }
 0x25c   :  { %743 = vmatmul.mubr.bf16.gmra.mxu1 %v579_v40 }
 0x25d   :  { %752 = vmatprep.mubr.bf16.mxu1 %v1273_v0 }
 0x264   :  { %753 = vmatmul.mubr.bf16.gmra.mxu1 %v580_v35 }
 0x265   :  { %762 = vmatprep.mubr.bf16.mxu1 %v1273_v0 }
 0x26c   :  { %763 = vmatmul.mubr.bf16.gmra.mxu1 %v581_v47 }
 0x26d   :  { %772 = vmatprep.mubr.bf16.mxu1 %v1273_v0 }
 0x274   :  { %773 = vmatmul.mubr.bf16.gmra.mxu1 %v582_v54 }
 0x275   :  { %782 = vmatprep.mubr.bf16.mxu1 %v1273_v0 }
 0x27c   :  { %783 = vmatmul.mubr.bf16.gmra.mxu1 %v583_v60 }
 0x304   :  { %v1427_v28 = vpop.f32.mrf.mxu1 }
 0x306   :  { %v716_v33 = vpop.f32.mrf.mxu1 }
 0x308   :  { %v1429_v58 = vpop.f32.mrf.mxu1 }
 0x30a   :  { %v720_v61 = vpop.f32.mrf.mxu1 }
 0x30b   :  { %v793_v56 = vpack.c.bf16 %v720_v61, %v716_v33 }
 0x30c   :  { %v724_v62 = vpop.f32.mrf.mxu1 }
 0x30e   :  { %v726_v63 = vpop.f32.mrf.mxu1 }
 0x310   :  { %v1431_v31 = vpop.f32.mrf.mxu1 }
 0x312   :  { %v730_v1 = vpop.f32.mrf.mxu1 }
 0x313   :  { %v794_v34 = vpack.c.bf16 %v730_v1, %v726_v63 }
 0x314   :  { %v1433_v2 = vpop.f32.mrf.mxu1 }
 0x316   :  { %v736_v0 = vpop.f32.mrf.mxu1 }
 0x318   :  { %v1435_v3 = vpop.f32.mrf.mxu1 }
 0x31a   :  { %v740_v6 = vpop.f32.mrf.mxu1 }
 0x31b   :  { %v795_v37 = vpack.c.bf16 %v740_v6, %v736_v0 }
 0x31c   :  { %v1437_v7 = vpop.f32.mrf.mxu1 }
 0x31e   :  { %v746_v8 = vpop.f32.mrf.mxu1 }
 0x320   :  { %v1439_v9 = vpop.f32.mrf.mxu1 }
 0x322   :  { %v750_v38 = vpop.f32.mrf.mxu1 }
 0x323   :  { %v796_v44 = vpack.c.bf16 %v750_v38, %v746_v8 }
 0x324   :  { %v1441_v12 = vpop.f32.mrf.mxu1 }
 0x326   :  { %v756_v13 = vpop.f32.mrf.mxu1 }
 0x328   :  { %v1443_v36 = vpop.f32.mrf.mxu1 }
 0x32a   :  { %v760_v14 = vpop.f32.mrf.mxu1 }
 0x32b   :  { %v797_v35 = vpack.c.bf16 %v760_v14, %v756_v13 }
 0x32c   :  { %v1445_v15 = vpop.f32.mrf.mxu1 }
 0x32e   :  { %v766_v18 = vpop.f32.mrf.mxu1 }
 0x330   :  { %v1447_v20 = vpop.f32.mrf.mxu1 }
 0x332   :  { %v770_v21 = vpop.f32.mrf.mxu1 }
 0x333   :  { %v798_v32 = vpack.c.bf16 %v770_v21, %v766_v18 }
 0x334   :  { %v1449_v42 = vpop.f32.mrf.mxu1 }
 0x336   :  { %v776_v22 = vpop.f32.mrf.mxu1 }
 0x338   :  { %v1451_v40 = vpop.f32.mrf.mxu1 }
 0x33a   :  { %v780_v23 = vpop.f32.mrf.mxu1 }
 0x33b   :  { %v799_v46 = vpack.c.bf16 %v780_v23, %v776_v22 }
 0x33c   :  { %v1453_v24 = vpop.f32.mrf.mxu1 }
 0x33e   :  { %v786_v25 = vpop.f32.mrf.mxu1 }
 0x340   :  { %v1455_v27 = vpop.f32.mrf.mxu1 }
 0x342   :  { %v790_v29 = vpop.f32.mrf.mxu1 }
 0x343   :  { %v800_v30 = vpack.c.bf16 %v790_v29, %v786_v25 }
 0x345   :  { %1074 = vmatprep.subr.bf16.mxu0 %v800_v30 }
 0x346   :  { %1075 = vmatpush3.bf16.msra.mxu0 %v800_v30 }
 0x347   :  { %1076 = vmatprep.subr.bf16.mxu0 %v799_v46 }
 0x34a   :  { %1077 = vmatpush3.bf16.msra.mxu0 %v799_v46 }
 0x34b   :  { %1078 = vmatprep.subr.bf16.mxu0 %v798_v32 }
 0x34e   :  { %1079 = vmatpush3.bf16.msra.mxu0 %v798_v32 }
 0x34f   :  { %1080 = vmatprep.subr.bf16.mxu0 %v797_v35 }
 0x352   :  { %1081 = vmatpush3.bf16.msra.mxu0 %v797_v35 }
 0x353   :  { %1082 = vmatprep.subr.bf16.mxu0 %v796_v44 }
 0x356   :  { %1083 = vmatpush3.bf16.msra.mxu0 %v796_v44 }
 0x357   :  { %1084 = vmatprep.subr.bf16.mxu0 %v795_v37 }
 0x35a   :  { %1085 = vmatpush3.bf16.msra.mxu0 %v795_v37 }
 0x35b   :  { %1086 = vmatprep.subr.bf16.mxu0 %v794_v34 }
 0x35e   :  { %1087 = vmatpush3.bf16.msra.mxu0 %v794_v34 }
 0x35f   :  { %1088 = vmatprep.subr.bf16.mxu0 %v793_v56 }
 0x362   :  { %1089 = vmatpush3.bf16.msra.mxu0 %v793_v56 }
 0x365   :  { %1091 = vmatmul.mubr.bf16.vlgmr.msra.gmra.mxu0 %v1361_v4 }
 0x366   :  { %1094 = vmatprep.mubr.bf16.mxu0 %v1363_v5 }
 0x36d   :  { %1095 = vmatmul.mubr.bf16.gmra.mxu0 %v1367_v10 }
 0x36e   :  { %1098 = vmatprep.mubr.bf16.mxu0 %v1369_v11 }
 0x375   :  { %1099 = vmatmul.mubr.bf16.gmra.mxu0 %v1373_v16 }
 0x376   :  { %1102 = vmatprep.mubr.bf16.mxu0 %v1375_v17 }
 0x37d   :  { %1103 = vmatmul.mubr.bf16.gmra.mxu0 %v1379_v19 }
 0x425   :  { %v1092_v39 = vpop.f32.mrf.mxu0 }
 0x426   :  { %v900_v43 = vadd.f32 %v1092_v39, %v724_v62 }
 0x427   :  { %v835_v50 = vpop.f32.mrf.mxu0 }
 0x428   :  { %v923_v4 = vadd.f32 %v1009_v41, %v900_v43  ;;  %v898_v5 = vadd.f32 %v835_v50, %v1427_v28 }
 0x429   :  { %v1093_v45 = vpop.f32.mrf.mxu0 }
 0x42a   :  { %939 = vst [vmem:[%s1536_s6 + $0x10] sm:$0xff] %v923_v4  ;;  %v921_v10 = vadd.f32 %v1009_v41, %v898_v5  ;;  %v901_v11 = vadd.f32 %v1093_v45, %v1431_v31 }
 0x42b   :  { %v838_v16 = vpop.f32.mrf.mxu0 }
 0x42c   :  { %937 = vst [vmem:[%s1536_s6] sm:$0xff] %v921_v10  ;;  %v924_v17 = vadd.f32 %v1009_v41, %v901_v11  ;;  %v899_v19 = vadd.f32 %v838_v16, %v1429_v58 }
 0x42d   :  { %v1096_v47 = vpop.f32.mrf.mxu0 }
 0x42e   :  { %940 = vst [vmem:[%s1536_s6 + $0x18] sm:$0xff] %v924_v17  ;;  %v922_v48 = vadd.f32 %v1009_v41, %v899_v19  ;;  %v904_v49 = vadd.f32 %v1096_v47, %v1437_v7 }
 0x42f   :  { %v851_v26 = vpop.f32.mrf.mxu0 }
 0x430   :  { %938 = vst [vmem:[%s1536_s6 + $0x8] sm:$0xff] %v922_v48  ;;  %v927_v51 = vadd.f32 %v1009_v41, %v904_v49  ;;  %v902_v53 = vadd.f32 %v851_v26, %v1433_v2 }
 0x431   :  { %v1097_v55 = vpop.f32.mrf.mxu0 }
 0x432   :  { %943 = vst [vmem:[%s1536_s6 + $0x30] sm:$0xff] %v927_v51  ;;  %v925_v54 = vadd.f32 %v1009_v41, %v902_v53  ;;  %v905_v57 = vadd.f32 %v1097_v55, %v1439_v9 }
 0x433   :  { %v854_v52 = vpop.f32.mrf.mxu0 }
 0x434   :  { %941 = vst [vmem:[%s1536_s6 + $0x20] sm:$0xff] %v925_v54  ;;  %v928_v59 = vadd.f32 %v1009_v41, %v905_v57  ;;  %v903_v60 = vadd.f32 %v854_v52, %v1435_v3 }
 0x435   :  { %v1100_v28 = vpop.f32.mrf.mxu0 }
 0x436   :  { %944 = vst [vmem:[%s1536_s6 + $0x38] sm:$0xff] %v928_v59  ;;  %v926_v33 = vadd.f32 %v1009_v41, %v903_v60  ;;  %v908_v58 = vadd.f32 %v1100_v28, %v1445_v15 }
 0x437   :  { %v867_v61 = vpop.f32.mrf.mxu0 }
 0x438   :  { %942 = vst [vmem:[%s1536_s6 + $0x28] sm:$0xff] %v926_v33  ;;  %v931_v56 = vadd.f32 %v1009_v41, %v908_v58  ;;  %v906_v62 = vadd.f32 %v867_v61, %v1441_v12 }
 0x439   :  { %v1101_v63 = vpop.f32.mrf.mxu0 }
 0x43a   :  { %947 = vst [vmem:[%s1536_s6 + $0x50] sm:$0xff] %v931_v56  ;;  %v929_v31 = vadd.f32 %v1009_v41, %v906_v62  ;;  %v909_v1 = vadd.f32 %v1101_v63, %v1447_v20 }
 0x43b   :  { %v870_v34 = vpop.f32.mrf.mxu0 }
 0x43c   :  { %945 = vst [vmem:[%s1536_s6 + $0x40] sm:$0xff] %v929_v31  ;;  %v932_v2 = vadd.f32 %v1009_v41, %v909_v1  ;;  %v907_v0 = vadd.f32 %v870_v34, %v1443_v36 }
 0x43d   :  { %v1104_v3 = vpop.f32.mrf.mxu0 }
 0x43e   :  { %948 = vst [vmem:[%s1536_s6 + $0x58] sm:$0xff] %v932_v2  ;;  %v930_v6 = vadd.f32 %v1009_v41, %v907_v0  ;;  %v912_v7 = vadd.f32 %v1104_v3, %v1453_v24 }
 0x43f   :  { %v883_v8 = vpop.f32.mrf.mxu0 }
 0x440   :  { %946 = vst [vmem:[%s1536_s6 + $0x48] sm:$0xff] %v930_v6  ;;  %v935_v9 = vadd.f32 %v1009_v41, %v912_v7  ;;  %v910_v38 = vadd.f32 %v883_v8, %v1449_v42 }
 0x441   :  { %v1105_v12 = vpop.f32.mrf.mxu0 }
 0x442   :  { %951 = vst [vmem:[%s1536_s6 + $0x70] sm:$0xff] %v935_v9  ;;  %v933_v13 = vadd.f32 %v1009_v41, %v910_v38  ;;  %v913_v36 = vadd.f32 %v1105_v12, %v1455_v27 }
 0x443   :  { %v886_v14 = vpop.f32.mrf.mxu0 }
 0x444   :  { %949 = vst [vmem:[%s1536_s6 + $0x60] sm:$0xff] %v933_v13  ;;  %v936_v15 = vadd.f32 %v1009_v41, %v913_v36  ;;  %v911_v18 = vadd.f32 %v886_v14, %v1451_v40 }
 0x446   :  { %952 = vst [vmem:[%s1536_s6 + $0x78] sm:$0xff] %v936_v15  ;;  %v934_v20 = vadd.f32 %v1009_v41, %v911_v18 }
 0x448   :  { %950 = vst [vmem:[%s1536_s6 + $0x68] sm:$0xff] %v934_v20 }
 0x449   :  { %957 = vsyncpa [#allocation3], 1 }
 0x44a   :  { %958 = vsyncpa [#allocation5], 1 }
 0x44b   :  { %959 = vsyncpa [#allocation8], 1 }

</bundles_post_ra>
